<compile_context>
chip_gen: v5e
topology: v5e:2x2
jax: 0.10.0
libtpu: 0.0.40
codegen_flags: <defaults>
</compile_context>

<pallas_src>
import functools

import jax
import jax.numpy as jnp
from jax import lax
from jax.experimental import pallas as pl
from jax.experimental.pallas import tpu as pltpu

LANE = 128
SUBLANE = 8
TARGET_BLOCK_BYTES = 4 << 20   # ~4 MiB per DMA buffer (native dtype)
CHUNK_ROWS_MAX = 512           # inner compute chunk: 512 x 128 f32 = 256 KiB temps
FAST_PATH_ELEMS = 1 << 17      # below this, plain fused JAX beats a pallas_call


def _elementwise_loss(x, *, gan_type, target_is_real, is_disc,
                      real_label_val, fake_label_val):
    """Per-element loss value (before the mean). All branches are static."""
    if gan_type == 'vanilla':
        # nn.BCEWithLogitsLoss(input, t) with constant target t:
        #   max(x, 0) - x*t + log1p(exp(-|x|))
        t = real_label_val if target_is_real else fake_label_val
        return jnp.maximum(x, 0.0) - x * t + jnp.log1p(jnp.exp(-jnp.abs(x)))
    elif gan_type == 'lsgan':
        t = real_label_val if target_is_real else fake_label_val
        d = x - t
        return d * d
    elif gan_type == 'wgan':
        return -x if target_is_real else x
    elif gan_type == 'wgan_softplus':
        z = -x if target_is_real else x
        # numerically stable softplus
        return jnp.maximum(z, 0.0) + jnp.log1p(jnp.exp(-jnp.abs(z)))
    elif gan_type == 'hinge':
        if is_disc:
            z = -x if target_is_real else x
            return jnp.maximum(1.0 + z, 0.0)
        else:
            return -x
    else:
        raise NotImplementedError(f'GAN type {gan_type} is not implemented.')


def _tensorcores_per_chip():
    """Static heuristic: 2 TensorCores per device on megacore parts."""
    try:
        kind = jax.devices()[0].device_kind.lower()
    except Exception:
        return 1
    if any(tag in kind for tag in ('v4', 'v5p', 'v7', '7x')):
        return 2
    return 1


def _block_partial_sum(x_ref, *, block_rows, chunk_rows, loss_kwargs,
                       valid_rows=None):
    """Sum the elementwise loss over a (block_rows, 128) block into (8, 128).

    Consumes the block in chunk_rows-row sub-chunks so the f32 upcast / loss /
    mask temporaries stay bounded regardless of the DMA block size.
    """
    nchunks = block_rows // chunk_rows

    def chunk_sum(j, acc):
        if isinstance(j, int):
            start = j * chunk_rows
        else:
            start = pl.multiple_of(j * chunk_rows, chunk_rows)
        xs = x_ref[pl.ds(start, chunk_rows), :].astype(jnp.float32)
        per = _elementwise_loss(xs, **loss_kwargs)
        if valid_rows is not None:
            row_ids = lax.broadcasted_iota(jnp.int32, per.shape, 0) + j * chunk_rows
            per = jnp.where(row_ids < valid_rows, per, 0.0)
        # Fold (chunk_rows, 128) -> (8, 128) with pure vreg adds (no XLU).
        return acc + per.reshape(chunk_rows // SUBLANE, SUBLANE, LANE).sum(axis=0)

    init = jnp.zeros((SUBLANE, LANE), jnp.float32)
    if nchunks == 1:
        return chunk_sum(0, init)
    return lax.fori_loop(0, nchunks, chunk_sum, init, unroll=min(4, nchunks))


def _ganloss_partial_kernel(x_ref, out_ref, *, loss_kwargs, rows, block_rows,
                            chunk_rows, nb_per_core, num_cores, has_edge):
    """Accumulate per-block loss sums into a resident (8, 128) output block."""
    if num_cores > 1:
        c = pl.program_id(0)     # core (parallel) axis
        i = pl.program_id(1)     # row-block (reduction / arbitrary) axis
        block_idx = c * nb_per_core + i
    else:
        i = pl.program_id(0)
        block_idx = i

    @pl.when(i == 0)
    def _init():
        out_ref[...] = jnp.zeros_like(out_ref)

    sum_fn = functools.partial(
        _block_partial_sum, x_ref,
        block_rows=block_rows, chunk_rows=chunk_rows, loss_kwargs=loss_kwargs)

    if not has_edge:
        # Slab divides evenly: every block is full, no mask work at all.
        out_ref[...] += sum_fn()
    else:
        valid = rows - block_idx * block_rows   # may be <= 0 for duplicated blocks
        is_full = valid >= block_rows

        @pl.when(is_full)
        def _interior():
            out_ref[...] += sum_fn()

        @pl.when(jnp.logical_not(is_full))
        def _edge():
            out_ref[...] += sum_fn(valid_rows=valid)


def gan_loss(inputs, target_is_real, is_disc=False, *,
             gan_type='vanilla', real_label_val=1.0, fake_label_val=0.0,
             loss_weight=1.0, use_pallas=None):
    """JAX/Pallas equivalent of GANLoss.forward."""
    n = int(inputs.size)
    loss_kwargs = dict(
        gan_type=gan_type,
        target_is_real=bool(target_is_real),
        is_disc=bool(is_disc),
        real_label_val=float(real_label_val),
        fake_label_val=float(fake_label_val),
    )

    if use_pallas is None:
        use_pallas = n >= FAST_PATH_ELEMS

    if not use_pallas:
        # Small-input fast path: fused XLA elementwise + mean is at roofline.
        loss = jnp.mean(_elementwise_loss(inputs.astype(jnp.float32),
                                          **loss_kwargs))
        return loss if is_disc else loss * jnp.float32(loss_weight)

    flat = jnp.ravel(inputs)  # free reshape of the contiguous NCHW array
    itemsize = jnp.dtype(inputs.dtype).itemsize
    row_align = max(SUBLANE, 32 // max(itemsize, 1))   # 8 f32 / 16 bf16 / 32 i8

    # Aligned prefix handled by the kernel; tiny ragged tail in plain JAX.
    n_main = (n // (row_align * LANE)) * (row_align * LANE)

    total = jnp.float32(0.0)

    if n_main > 0:
        main = flat if n_main == n else flat[:n_main]
        rows = n_main // LANE                          # multiple of row_align
        slab = main.reshape(rows, LANE)

        # DMA block sized by bytes (~4 MiB/buffer), dtype-tile aligned.
        block_rows_cap = max(row_align, TARGET_BLOCK_BYTES // (LANE * itemsize))
        block_rows = min(block_rows_cap, rows)
        chunk_rows = min(CHUNK_ROWS_MAX, block_rows)
        block_rows = (block_rows // chunk_rows) * chunk_rows

        nb_total = pl.cdiv(rows, block_rows)
        num_cores = 2 if (_tensorcores_per_chip() >= 2 and nb_total >= 2) else 1
        nb_per_core = pl.cdiv(nb_total, num_cores)
        needs_clamp = num_cores * nb_per_core != nb_total
        # If clamping happens, has_edge is necessarily True -> duplicates masked.
        has_edge = num_cores * nb_per_core * block_rows != rows

        if num_cores > 1:
            if needs_clamp:
                def in_index_map(c, i):
                    return (jnp.minimum(c * nb_per_core + i, nb_total - 1), 0)
            else:
                def in_index_map(c, i):
                    return (c * nb_per_core + i, 0)
            grid = (num_cores, nb_per_core)
            out_specs = pl.BlockSpec((SUBLANE, LANE), lambda c, i: (c, 0))
            out_rows = num_cores * SUBLANE
            # TODO(synk): if profiling on v7x shows the leading "parallel" axis is
            # not sharded across the two TensorCores, switch it to pltpu.CORE_PARALLEL.
            dims = ("parallel", "arbitrary")
        else:
            def in_index_map(i):
                return (i, 0)
            grid = (nb_total,)
            out_specs = pl.BlockSpec((SUBLANE, LANE), lambda i: (0, 0))
            out_rows = SUBLANE
            dims = ("arbitrary",)

        block_bytes = block_rows * LANE * itemsize
        vmem_limit = 2 * block_bytes + 8 * chunk_rows * LANE * 4 + (4 << 20)
        vmem_limit = int(min(max(vmem_limit, 16 << 20), 48 << 20))

        kernel = functools.partial(
            _ganloss_partial_kernel,
            loss_kwargs=loss_kwargs,
            rows=rows,
            block_rows=block_rows,
            chunk_rows=chunk_rows,
            nb_per_core=nb_per_core,
            num_cores=num_cores,
            has_edge=has_edge,
        )

        partials = pl.pallas_call(
            kernel,
            out_shape=jax.ShapeDtypeStruct((out_rows, LANE), jnp.float32),
            grid=grid,
            in_specs=[pl.BlockSpec((block_rows, LANE), in_index_map)],
            out_specs=out_specs,
            compiler_params=pltpu.CompilerParams(
                dimension_semantics=dims,
                vmem_limit_bytes=vmem_limit),
        )(slab)
        total = total + jnp.sum(partials)

    if n_main < n:
        # Tiny ragged tail (< row_align*128 elements): pure JAX, negligible.
        tail = flat[n_main:].astype(jnp.float32)
        total = total + jnp.sum(_elementwise_loss(tail, **loss_kwargs))

    loss = total / jnp.float32(n)
    return loss if is_disc else loss * jnp.float32(loss_weight)


def _reference(inputs, target_is_real, is_disc, *, gan_type,
               real_label_val=1.0, fake_label_val=0.0, loss_weight=1.0):
    x = inputs.astype(jnp.float32)
    per = _elementwise_loss(
        x, gan_type=gan_type, target_is_real=bool(target_is_real),
        is_disc=bool(is_disc), real_label_val=real_label_val,
        fake_label_val=fake_label_val)
    loss = jnp.mean(per)
    return loss if is_disc else loss * loss_weight


if __name__ == "__main__":
    key = jax.random.PRNGKey(0)
    x_small = jax.random.normal(key, (2, 4, 16, 16), dtype=jnp.float32)  # NCHW logits

    cases = [
        ('vanilla', True, False),
        ('vanilla', False, True),
        ('lsgan', True, False),
        ('wgan', False, True),
        ('wgan_softplus', True, True),
        ('hinge', True, True),
        ('hinge', False, False),
    ]

    # Small PatchGAN-style map: force the Pallas path so the kernel is exercised.
    for gan_type, target_is_real, is_disc in cases:
        out = gan_loss(x_small, target_is_real, is_disc,
                       gan_type=gan_type, loss_weight=2.0, use_pallas=True)
        out = jax.block_until_ready(out)
        ref = _reference(x_small, target_is_real, is_disc,
                         gan_type=gan_type, loss_weight=2.0)
        assert jnp.allclose(out, ref, atol=1e-5, rtol=1e-4), \
            (gan_type, float(out), float(ref))

    # Larger map: auto-dispatch through the kernel path, exercising multi-block
    # grid, partial edge block masking, and the ragged plain-JAX tail.
    x_big = jax.random.normal(jax.random.PRNGKey(0), (3, 8, 129, 130),
                              dtype=jnp.float32)
    for gan_type, target_is_real, is_disc in [('vanilla', True, False),
                                              ('hinge', False, True),
                                              ('wgan_softplus', False, False)]:
        out = gan_loss(x_big, target_is_real, is_disc,
                       gan_type=gan_type, loss_weight=2.0)
        out = jax.block_until_ready(out)
        ref = _reference(x_big, target_is_real, is_disc,
                         gan_type=gan_type, loss_weight=2.0)
        assert jnp.allclose(out, ref, atol=1e-5, rtol=1e-4), \
            (gan_type, float(out), float(ref))

    print("KERNEL_OK")
</pallas_src>

<mosaic_0001>
module attributes {stable_mosaic.version = 11 : i64} {
  func.func @_ganloss_partial_kernel(%arg0: i32, %arg1: memref<16x128xf32, #tpu.memory_space<vmem>>, %arg2: memref<8x128xf32, #tpu.memory_space<vmem>>) attributes {dimension_semantics = [#tpu.dimension_semantics<arbitrary>], iteration_bounds = array<i64: 1>, scalar_prefetch = 0 : i64, scratch_operands = 0 : i64, tpu.core_type = #tpu.core_type<tc>, window_params = [{transform_indices = @transform_0, window_bounds = array<i64: 16, 128>}, {pipeline_mode = #tpu.pipeline_mode<synchronous>, transform_indices = @transform_1, window_bounds = array<i64: 8, 128>}]} {
    %c0_i32 = arith.constant 0 : i32
    %0 = arith.cmpi eq, %arg0, %c0_i32 : i32
    %1 = arith.extui %0 : i1 to i32
    %c0_i32_0 = arith.constant 0 : i32
    %2 = arith.cmpi ne, %1, %c0_i32_0 : i32
    scf.if %2 {
      %cst_10 = arith.constant 0.000000e+00 : f32
      %22 = vector.broadcast %cst_10 : f32 to vector<8x128xf32>
      %c0_11 = arith.constant 0 : index
      %c0_12 = arith.constant 0 : index
      %23 = vector.load %arg2[%c0_11, %c0_12] : memref<8x128xf32, #tpu.memory_space<vmem>>, vector<8x128xf32>
      tpu.vector_store %arg2[%c0_11, %c0_12], %22 {strides = array<i32>} : memref<8x128xf32, #tpu.memory_space<vmem>>, vector<8x128xf32>,
    } else {
    }
    %c0 = arith.constant 0 : index
    %c0_1 = arith.constant 0 : index
    %3 = vector.load %arg2[%c0, %c0_1] : memref<8x128xf32, #tpu.memory_space<vmem>>, vector<8x128xf32>
    %cst = arith.constant 0.000000e+00 : f32
    %4 = vector.broadcast %cst : f32 to vector<8x128xf32>
    %c0_2 = arith.constant 0 : index
    %c0_3 = arith.constant 0 : index
    %5 = vector.load %arg1[%c0_2, %c0_3] : memref<16x128xf32, #tpu.memory_space<vmem>>, vector<16x128xf32>
    %cst_4 = arith.constant 0.000000e+00 : f32
    %6 = vector.broadcast %cst_4 : f32 to vector<16x128xf32>
    %7 = arith.maximumf %5, %6 : vector<16x128xf32>
    %cst_5 = arith.constant 1.000000e+00 : f32
    %8 = vector.broadcast %cst_5 : f32 to vector<16x128xf32>
    %9 = arith.mulf %5, %8 : vector<16x128xf32>
    %10 = arith.subf %7, %9 : vector<16x128xf32>
    %11 = math.absf %5 : vector<16x128xf32>
    %cst_6 = arith.constant 0.000000e+00 : f32
    %12 = vector.broadcast %cst_6 : f32 to vector<16x128xf32>
    %13 = arith.subf %12, %11 : vector<16x128xf32>
    %14 = math.exp %13 : vector<16x128xf32>
    %15 = math.log1p %14 : vector<16x128xf32>
    %16 = arith.addf %10, %15 : vector<16x128xf32>
    %17 = vector.shape_cast %16 : vector<16x128xf32> to vector<2x8x128xf32>
    %cst_7 = arith.constant dense<0.000000e+00> : vector<8x128xf32>
    %18 = vector.multi_reduction <add>, %17, %cst_7 [0] : vector<2x8x128xf32> to vector<8x128xf32>
    %19 = arith.addf %4, %18 : vector<8x128xf32>
    %20 = arith.addf %3, %19 : vector<8x128xf32>
    %c0_8 = arith.constant 0 : index
    %c0_9 = arith.constant 0 : index
    %21 = vector.load %arg2[%c0_8, %c0_9] : memref<8x128xf32, #tpu.memory_space<vmem>>, vector<8x128xf32>
    tpu.vector_store %arg2[%c0_8, %c0_9], %20 {strides = array<i32>} : memref<8x128xf32, #tpu.memory_space<vmem>>, vector<8x128xf32>,
    return
  }
  func.func @transform_0(%arg0: i32) -> (i32, i32) {
    %c0_i32 = arith.constant 0 : i32
    %c0_i32_0 = arith.constant 0 : i32
    return %arg0, %c0_i32 : i32, i32
  }
  func.func @transform_1(%arg0: i32) -> (i32, i32) {
    %c0_i32 = arith.constant 0 : i32
    %c0_i32_0 = arith.constant 0 : i32
    %c0_i32_1 = arith.constant 0 : i32
    return %c0_i32, %c0_i32_0 : i32, i32
  }
}

</mosaic_0001>

<bundles_post_ra>
// kernel: tpu_custom_call.1
= control target key start
LH: loop header
LB: loop body
LE: loop exit
PB: predicated region body
PF: predicated region fallthrough
CT: control target
= control target key end

     0   :  { %6 = vsyncpa [#allocation3], 0  ;;  %s171_s0 = inlined_call_operand.hbm [shape: f32[16,128], index: 0, kind: input, shape index: {}]   ;;  %s172_s1 = inlined_call_operand.hbm [shape: f32[8,128], index: 1, kind: output, shape index: {}]  }
   0x1   :  { %7 = vsyncpa [#allocation4], 0  ;;  %s12_s8 = sshll.u32 %s171_s0, 4  ;;  %s151_s9 = smov [#allocation2]   ;;  %s13_s8 = int_to_ptr.hbm [resolvable:$true] %s12_s8 }
   0x2   :  { %s14_s10 = sshll.u32 %s151_s9, 4  ;;  %s152_s11 = smov 128   ;;  %s15_s10 = int_to_ptr.vmem [resolvable:$true] %s14_s10 }
   0x3   :  { %s153_s12 = smov 8  }
   0x4   :  { %20 = dma.hbm_to_vmem [thread:$0]  %s13_s8, 256, %s15_s10, [#allocation3], %s152_s11, %s152_s11, %s153_s12  }
   0x5   :  { %147 = dma.done.wait [#allocation3], 256  }
   0x6   :  { %148 = vsyncadd [#allocation3], 4294967040  ;;  %v31_v0 = vld [vmem:[#allocation2] sm:$0xff]  ;;  %v32_v1 = vld [vmem:[#allocation2 + $0x8] sm:$0xff]  ;;  %s154_s0 = smov [#allocation5]   ;;  %s76_s16 = sshll.u32 %s172_s1, 4  ;;  %s77_s16 = int_to_ptr.hbm [resolvable:$true] %s76_s16 }
   0x7   :  { %v37_v2 = vand.u32 2147483647, %v31_v0  ;;  %v38_v3 = vand.u32 2147483647, %v32_v1  ;;  %v33_v15 = vmax.f32 %v31_v0, 0.0  ;;  %v34_v18 = vmax.f32 %v32_v1, 0.0 }
   0x8   :  { %s74_s13 = sshll.u32 %s154_s0, 4  ;;  %s75_s13 = int_to_ptr.vmem [resolvable:$true] %s74_s13 }
   0x9   :  { %v39_v4 = vsub.f32 0.0, %v37_v2  ;;  %v40_v5 = vsub.f32 0.0, %v38_v3  ;;  %v35_v22 = vsub.f32 %v33_v15, %v31_v0  ;;  %v36_v25 = vsub.f32 %v34_v18, %v32_v1 }
   0xb   :  { %v41_v6 = vmul.f32 1.442695, %v39_v4  ;;  %v43_v7 = vmul.f32 1.442695, %v40_v5 }
   0xd   :  { %91 = vpow2.f32 %v41_v6 }
   0xe   :  { %93 = vpow2.f32 %v43_v7 }
  0x13   :  { %v92_v8 = vpop.eup %91 }
  0x14   :  { %v94_v9 = vpop.eup %93  ;;  %v45_v10 = vadd.f32 1.0, %v92_v8  ;;  %v48_v11 = vmul.f32 -0.5, %v92_v8  ;;  %v51_v16 = vand.u32 2147483647, %v92_v8 }
  0x15   :  { %v54_v12 = vadd.f32 1.0, %v94_v9  ;;  %v57_v13 = vmul.f32 -0.5, %v94_v9  ;;  %v60_v19 = vand.u32 2147483647, %v94_v9 }
  0x16   :  { %95 = vlog2.f32 %v45_v10  ;;  %v49_v14 = vadd.f32 1.0, %v48_v11  ;;  %vm52_vm0 = vcmp.lt.f32.partialorder %v51_v16, 0.0004427343 }
  0x17   :  { %97 = vlog2.f32 %v54_v12  ;;  %v58_v17 = vadd.f32 1.0, %v57_v13  ;;  %vm61_vm1 = vcmp.lt.f32.partialorder %v60_v19, 0.0004427343 }
  0x18   :  { %v50_v20 = vmul.f32 %v92_v8, %v49_v14 }
  0x19   :  { %v59_v23 = vmul.f32 %v94_v9, %v58_v17 }
  0x1c   :  { %v96_v21 = vpop.eup %95 }
  0x1d   :  { %v98_v24 = vpop.eup %97  ;;  %v47_v26 = vmul.f32 0.6931472, %v96_v21 }
  0x1e   :  { %v56_v27 = vmul.f32 0.6931472, %v98_v24 }
  0x1f   :  { %v53_v28 = vsel %vm52_vm0, %v50_v20, %v47_v26 }
  0x20   :  { %v62_v29 = vsel %vm61_vm1, %v59_v23, %v56_v27  ;;  %v63_v30 = vadd.f32 %v53_v28, %v35_v22 }
  0x21   :  { %v64_v31 = vadd.f32 %v62_v29, %v36_v25 }
  0x23   :  { %v65_v32 = vadd.f32 %v64_v31, %v63_v30 }
  0x25   :  { %68 = vst [vmem:[#allocation5] sm:$0xff] %v65_v32 }
  0x26   :  { %79 = dma.vmem_to_hbm [thread:$0]  %s75_s13, 128, %s77_s16, [#allocation4]  }
  0x27   :  { %149 = dma.done.wait [#allocation4], 128  }
  0x28   :  { %150 = vsyncadd [#allocation4], 4294967168 }
  0x29   :  { %84 = vsyncpa [#allocation3], 1 }
  0x2a   :  { %85 = vsyncpa [#allocation4], 1 }

</bundles_post_ra>
